<compile_context>
chip_gen: v5e
topology: v5e:2x2
jax: 0.10.0
libtpu: 0.0.40
codegen_flags: <defaults>
</compile_context>

<pallas_src>
import functools

import jax
import jax.numpy as jnp
from jax.experimental import pallas as pl
from jax.experimental.pallas import tpu as pltpu

LANES = 128
ACC_ROWS = 8            # (8, 128) f32 = one vreg-shaped partial accumulator
CHUNK_ROWS = 256        # inner-loop chunk: 128 KiB per f32 intermediate
MAX_TILE_ROWS = 2048    # (2048,128) f32 = 1 MiB/input/tile; 4 MiB double-buffered


def _round_up(x, m):
    return ((x + m - 1) // m) * m


def _num_tensorcores():
    """Best-effort TC count: 2 on v7x (megacore sharding pays off), else 1."""
    try:
        info = pltpu.get_tpu_info()
        for name in ("num_cores", "num_tensorcores", "tensor_cores_per_chip",
                     "cores_per_chip", "num_cores_per_chip"):
            v = getattr(info, name, None)
            if isinstance(v, int) and v >= 1:
                return max(1, min(2, v))
    except Exception:
        pass
    return 1


def _elementwise_focal(x, t, gamma, alpha):
    """Per-element focal loss; overflow-safe, NaN-free for saturated logits.

    Uses exp(-|x|) (never overflows), log1p, and one exact reciprocal:
        softplus(-x) = relu(-x) + log1p(exp(-|x|))
        softplus( x) = relu( x) + log1p(exp(-|x|))
        log(pt)      = -softplus(-x);  log(1-pt) = -softplus(x)
        pt           = 1/(1+e)   if x >= 0 else e/(1+e)      (no cancellation)
    Note: intentionally finite where the PyTorch reference yields NaN/Inf
    (log(0)*0 for saturated logits).
    """
    ax = jnp.abs(x)
    ez = jnp.exp(-ax)                                # <= 1, never overflows
    lp = jnp.log1p(ez)
    r = pl.reciprocal(1.0 + ez, approx=False)        # exact; approx vrcp's ~1e-3
    er = ez * r                                      # error squared into weights
    pos = x >= 0.0                                   # would exceed tolerance
    pt = jnp.where(pos, r, er)
    one_m_pt = jnp.where(pos, er, r)
    log_pt = -(jnp.maximum(-x, 0.0) + lp)
    log_1m_pt = -(jnp.maximum(x, 0.0) + lp)

    if gamma == 2:
        w_pos = one_m_pt * one_m_pt                  # squares on the VPU, no pow
        w_neg = pt * pt
    else:
        w_pos = one_m_pt ** gamma                    # static Python gamma only
        w_neg = pt ** gamma

    return ((-alpha) * w_pos * t * log_pt
            - (1.0 - alpha) * w_neg * (1.0 - t) * log_1m_pt)


def _focal_loss_kernel(n_ref, p_ref, t_ref, out_ref, *,
                       gamma, alpha, tile_rows, chunk_rows, steps):
    c = pl.program_id(0)   # TensorCore shard (parallel axis)
    i = pl.program_id(1)   # sequential reduction step

    # Zero this shard's resident (1,8,128) output block at reduction start.
    @pl.when(i == 0)
    def _():
        out_ref[...] = jnp.zeros_like(out_ref)

    tile_elems = tile_rows * LANES
    base = (c * steps + i) * tile_elems      # global element offset of this tile
    n = n_ref[0]                             # total valid elements (SMEM scalar)
    rem = n - base
    n_chunks = tile_rows // chunk_rows

    def tile_sum(masked):
        # Chunked reduce keeps the elementwise live set at ~chunk_rows x 128
        # regardless of tile size (v7x VMEM safety).
        def body(ci, acc):
            r0 = pl.multiple_of(ci * chunk_rows, chunk_rows)
            x = p_ref[pl.ds(r0, chunk_rows), :].astype(jnp.float32)
            t = t_ref[pl.ds(r0, chunk_rows), :].astype(jnp.float32)
            loss = _elementwise_focal(x, t, gamma, alpha)
            if masked:
                row_ids = jax.lax.broadcasted_iota(
                    jnp.int32, (chunk_rows, LANES), 0)
                lane_ids = jax.lax.broadcasted_iota(
                    jnp.int32, (chunk_rows, LANES), 1)
                idx = base + (r0 + row_ids) * LANES + lane_ids
                # Select (not multiply): garbage in over-hanging edge rows may
                # be NaN/Inf and must not poison the sum.
                loss = jnp.where(idx < n, loss, 0.0)
            # (chunk,128) -> (8,128): pure vreg-wise VPU adds; the single
            # expensive cross-lane reduce happens once, in the wrapper.
            part = loss.reshape(chunk_rows // ACC_ROWS, ACC_ROWS, LANES).sum(0)
            return acc + part
        return jax.lax.fori_loop(0, n_chunks, body,
                                 jnp.zeros((ACC_ROWS, LANES), jnp.float32))

    # Interior tiles: fully valid, skip all iota/compare/select work.
    @pl.when(rem >= tile_elems)
    def _():
        out_ref[...] += tile_sum(False)[None]

    # Boundary (or fully out-of-range clamped) tiles: masked path.
    @pl.when(rem < tile_elems)
    def _():
        out_ref[...] += tile_sum(True)[None]


def bce_focal_loss(predict, target, gamma=2, alpha=0.25, reduction="sum"):
    """Pallas TPU implementation of BCEFocalLoss.forward."""
    assert predict.shape == target.shape
    if not isinstance(gamma, (int, float)):
        raise TypeError("gamma must be a static Python number")
    n_elem = int(predict.size)
    assert n_elem > 0

    num_shards = _num_tensorcores()
    rows = pl.cdiv(n_elem, LANES)            # rows of the logical (rows,128) slab
    rows_per_shard = pl.cdiv(rows, num_shards)
    if rows_per_shard <= CHUNK_ROWS:
        tile_rows = _round_up(rows_per_shard, 16)   # 16: bf16 sublane packing
        chunk_rows = tile_rows
    else:
        tile_rows = min(MAX_TILE_ROWS, _round_up(rows_per_shard, CHUNK_ROWS))
        chunk_rows = CHUNK_ROWS
    steps = pl.cdiv(rows, tile_rows * num_shards)
    last_block = pl.cdiv(rows, tile_rows) - 1       # clamp target for OOB blocks

    def to_slab(a):
        # Free reshape when n_elem % 128 == 0 (common NCHW case); otherwise only
        # the <128-element tail is padded.
        # TODO(synk): the ragged-tail jnp.pad still copies the array in HBM; a
        # 1D block + in-kernel reshape would avoid it at the cost of a relayout.
        flat = a.reshape(-1)
        pad = (-n_elem) % LANES
        if pad:
            flat = jnp.pad(flat, (0, pad))
        return flat.reshape(-1, LANES)

    p2 = to_slab(predict)
    t2 = to_slab(target)
    n_arr = jnp.array([n_elem], dtype=jnp.int32)

    def in_map(c, i, n):
        # Clamp fully out-of-range logical blocks to the last real block; their
        # contribution is zeroed by the in-kernel mask (base >= n).
        return (jnp.minimum(c * steps + i, last_block), 0)

    in_spec = pl.BlockSpec((tile_rows, LANES), in_map)
    out_spec = pl.BlockSpec((1, ACC_ROWS, LANES), lambda c, i, n: (c, 0, 0))

    kernel = functools.partial(
        _focal_loss_kernel, gamma=gamma, alpha=float(alpha),
        tile_rows=tile_rows, chunk_rows=chunk_rows, steps=steps)

    partials = pl.pallas_call(
        kernel,
        out_shape=jax.ShapeDtypeStruct((num_shards, ACC_ROWS, LANES),
                                       jnp.float32),
        grid_spec=pltpu.PrefetchScalarGridSpec(
            num_scalar_prefetch=1,
            grid=(num_shards, steps),
            in_specs=[in_spec, in_spec],
            out_specs=out_spec,
        ),
        compiler_params=pltpu.CompilerParams(
            dimension_semantics=("parallel", "arbitrary")),
    )(n_arr, p2, t2)

    loss_sum = jnp.sum(partials)   # one tiny cross-lane reduce outside the kernel
    if reduction == "sum":
        return loss_sum
    elif reduction == "mean":
        return loss_sum / n_elem
    else:
        # TODO(synk): reduction='none' would need the full per-element map out;
        # only 'sum' / 'mean' are implemented in-kernel.
        raise NotImplementedError("reduction must be 'sum' or 'mean'")


def _reference(predict, target, gamma=2, alpha=0.25):
    # Mirrors the PyTorch module's forward exactly.
    pt = jax.nn.sigmoid(predict.astype(jnp.float32))
    t = target.astype(jnp.float32)
    loss = (-alpha * (1 - pt) ** gamma * t * jnp.log(pt)
            - (1 - alpha) * pt ** gamma * (1 - t) * jnp.log(1 - pt))
    return jnp.sum(loss)


if __name__ == "__main__":
    key = jax.random.PRNGKey(0)
    k1, k2 = jax.random.split(key)
    # Small NCHW-shaped logits / binary targets, as a segmentation-style loss.
    shape = (2, 4, 16, 16)
    predict = jax.random.normal(k1, shape, dtype=jnp.float32)
    target = (jax.random.uniform(k2, shape) > 0.5).astype(jnp.float32)

    out = bce_focal_loss(predict, target, gamma=2, alpha=0.25, reduction="sum")
    out = jax.block_until_ready(out)

    ref = _reference(predict, target)
    assert jnp.allclose(out, ref, rtol=1e-5, atol=1e-4), (out, ref)
    print("KERNEL_OK")
</pallas_src>

<mosaic_0001>
module attributes {stable_mosaic.version = 11 : i64} {
  func.func @_focal_loss_kernel(%arg0: i32, %arg1: i32, %arg2: memref<1xi32, #tpu.memory_space<smem>>, %arg3: memref<16x128xf32, #tpu.memory_space<vmem>>, %arg4: memref<16x128xf32, #tpu.memory_space<vmem>>, %arg5: memref<1x8x128xf32, #tpu.memory_space<vmem>>) attributes {dimension_semantics = [#tpu.dimension_semantics<parallel>, #tpu.dimension_semantics<arbitrary>], iteration_bounds = array<i64: 1, 1>, scalar_prefetch = 1 : i64, scratch_operands = 0 : i64, tpu.core_type = #tpu.core_type<tc>, window_params = [{transform_indices = @transform_0, window_bounds = array<i64: 16, 128>}, {transform_indices = @transform_1, window_bounds = array<i64: 16, 128>}, {transform_indices = @transform_2, window_bounds = array<i64: 1, 8, 128>}]} {
    %c0_i32 = arith.constant 0 : i32
    %0 = arith.cmpi eq, %arg1, %c0_i32 : i32
    %1 = arith.extui %0 : i1 to i32
    %c0_i32_0 = arith.constant 0 : i32
    %2 = arith.cmpi ne, %1, %c0_i32_0 : i32
    scf.if %2 {
      %cst = arith.constant 0.000000e+00 : f32
      %14 = vector.broadcast %cst : f32 to vector<1x8x128xf32>
      %c0_5 = arith.constant 0 : index
      %c0_6 = arith.constant 0 : index
      %c0_7 = arith.constant 0 : index
      %15 = vector.load %arg5[%c0_5, %c0_6, %c0_7] : memref<1x8x128xf32, #tpu.memory_space<vmem>>, vector<1x8x128xf32>
      tpu.vector_store %arg5[%c0_5, %c0_6, %c0_7], %14 {strides = array<i32>} : memref<1x8x128xf32, #tpu.memory_space<vmem>>, vector<1x8x128xf32>,
    } else {
    }
    %c1_i32 = arith.constant 1 : i32
    %3 = arith.muli %arg0, %c1_i32 : i32
    %4 = arith.addi %3, %arg1 : i32
    %c2048_i32 = arith.constant 2048 : i32
    %5 = arith.muli %4, %c2048_i32 : i32
    %c0 = arith.constant 0 : index
    %6 = memref.load %arg2[%c0] : memref<1xi32, #tpu.memory_space<smem>>
    %7 = arith.subi %6, %5 : i32
    %c2048_i32_1 = arith.constant 2048 : i32
    %8 = arith.cmpi sge, %7, %c2048_i32_1 : i32
    %9 = arith.extui %8 : i1 to i32
    %c0_i32_2 = arith.constant 0 : i32
    %10 = arith.cmpi ne, %9, %c0_i32_2 : i32
    scf.if %10 {
      %c0_5 = arith.constant 0 : index
      %c0_6 = arith.constant 0 : index
      %c0_7 = arith.constant 0 : index
      %14 = vector.load %arg5[%c0_5, %c0_6, %c0_7] : memref<1x8x128xf32, #tpu.memory_space<vmem>>, vector<1x8x128xf32>
      %cst = arith.constant 0.000000e+00 : f32
      %15 = vector.broadcast %cst : f32 to vector<8x128xf32>
      %c0_i32_8 = arith.constant 0 : i32
      %c16_i32 = arith.constant 16 : i32
      %16 = arith.muli %c0_i32_8, %c16_i32 : i32
      %17 = tpu.assume_multiple %16, 16 : i32
      %18 = arith.index_cast %17 : i32 to index
      %c0_9 = arith.constant 0 : index
      %19 = vector.load %arg3[%18, %c0_9] : memref<16x128xf32, #tpu.memory_space<vmem>>, vector<16x128xf32>
      %20 = arith.index_cast %17 : i32 to index
      %c0_10 = arith.constant 0 : index
      %21 = vector.load %arg4[%20, %c0_10] : memref<16x128xf32, #tpu.memory_space<vmem>>, vector<16x128xf32>
      %22 = math.absf %19 : vector<16x128xf32>
      %cst_11 = arith.constant 0.000000e+00 : f32
      %23 = vector.broadcast %cst_11 : f32 to vector<16x128xf32>
      %24 = arith.subf %23, %22 : vector<16x128xf32>
      %25 = math.exp %24 : vector<16x128xf32>
      %26 = math.log1p %25 : vector<16x128xf32>
      %cst_12 = arith.constant 1.000000e+00 : f32
      %27 = vector.broadcast %cst_12 : f32 to vector<16x128xf32>
      %28 = arith.addf %27, %25 : vector<16x128xf32>
      %29 = tpu.reciprocal %28 : vector<16x128xf32> -> vector<16x128xf32>
      %30 = arith.mulf %25, %29 : vector<16x128xf32>
      %cst_13 = arith.constant 0.000000e+00 : f32
      %31 = vector.broadcast %cst_13 : f32 to vector<16x128xf32>
      %32 = arith.cmpf oge, %19, %31 : vector<16x128xf32>
      %33 = arith.select %32, %29, %30 : vector<16x128xi1>, vector<16x128xf32>
      %34 = arith.select %32, %30, %29 : vector<16x128xi1>, vector<16x128xf32>
      %cst_14 = arith.constant 0.000000e+00 : f32
      %35 = vector.broadcast %cst_14 : f32 to vector<16x128xf32>
      %36 = arith.subf %35, %19 : vector<16x128xf32>
      %cst_15 = arith.constant 0.000000e+00 : f32
      %37 = vector.broadcast %cst_15 : f32 to vector<16x128xf32>
      %38 = arith.maximumf %36, %37 : vector<16x128xf32>
      %39 = arith.addf %38, %26 : vector<16x128xf32>
      %cst_16 = arith.constant 0.000000e+00 : f32
      %40 = vector.broadcast %cst_16 : f32 to vector<16x128xf32>
      %41 = arith.subf %40, %39 : vector<16x128xf32>
      %cst_17 = arith.constant 0.000000e+00 : f32
      %42 = vector.broadcast %cst_17 : f32 to vector<16x128xf32>
      %43 = arith.maximumf %19, %42 : vector<16x128xf32>
      %44 = arith.addf %43, %26 : vector<16x128xf32>
      %cst_18 = arith.constant 0.000000e+00 : f32
      %45 = vector.broadcast %cst_18 : f32 to vector<16x128xf32>
      %46 = arith.subf %45, %44 : vector<16x128xf32>
      %47 = arith.mulf %34, %34 : vector<16x128xf32>
      %48 = arith.mulf %33, %33 : vector<16x128xf32>
      %cst_19 = arith.constant -2.500000e-01 : f32
      %49 = vector.broadcast %cst_19 : f32 to vector<16x128xf32>
      %50 = arith.mulf %49, %47 : vector<16x128xf32>
      %51 = arith.mulf %50, %21 : vector<16x128xf32>
      %52 = arith.mulf %51, %41 : vector<16x128xf32>
      %cst_20 = arith.constant 7.500000e-01 : f32
      %53 = vector.broadcast %cst_20 : f32 to vector<16x128xf32>
      %54 = arith.mulf %53, %48 : vector<16x128xf32>
      %cst_21 = arith.constant 1.000000e+00 : f32
      %55 = vector.broadcast %cst_21 : f32 to vector<16x128xf32>
      %56 = arith.subf %55, %21 : vector<16x128xf32>
      %57 = arith.mulf %54, %56 : vector<16x128xf32>
      %58 = arith.mulf %57, %46 : vector<16x128xf32>
      %59 = arith.subf %52, %58 : vector<16x128xf32>
      %60 = vector.shape_cast %59 : vector<16x128xf32> to vector<2x8x128xf32>
      %cst_22 = arith.constant dense<0.000000e+00> : vector<8x128xf32>
      %61 = vector.multi_reduction <add>, %60, %cst_22 [0] : vector<2x8x128xf32> to vector<8x128xf32>
      %62 = arith.addf %15, %61 : vector<8x128xf32>
      %c1_i32_23 = arith.constant 1 : i32
      %63 = vector.shape_cast %62 : vector<8x128xf32> to vector<1x8x128xf32>
      %64 = arith.addf %14, %63 : vector<1x8x128xf32>
      %c0_24 = arith.constant 0 : index
      %c0_25 = arith.constant 0 : index
      %c0_26 = arith.constant 0 : index
      %65 = vector.load %arg5[%c0_24, %c0_25, %c0_26] : memref<1x8x128xf32, #tpu.memory_space<vmem>>, vector<1x8x128xf32>
      tpu.vector_store %arg5[%c0_24, %c0_25, %c0_26], %64 {strides = array<i32>} : memref<1x8x128xf32, #tpu.memory_space<vmem>>, vector<1x8x128xf32>,
    } else {
    }
    %c2048_i32_3 = arith.constant 2048 : i32
    %11 = arith.cmpi slt, %7, %c2048_i32_3 : i32
    %12 = arith.extui %11 : i1 to i32
    %c0_i32_4 = arith.constant 0 : i32
    %13 = arith.cmpi ne, %12, %c0_i32_4 : i32
    scf.if %13 {
      %c0_5 = arith.constant 0 : index
      %c0_6 = arith.constant 0 : index
      %c0_7 = arith.constant 0 : index
      %14 = vector.load %arg5[%c0_5, %c0_6, %c0_7] : memref<1x8x128xf32, #tpu.memory_space<vmem>>, vector<1x8x128xf32>
      %cst = arith.constant 0.000000e+00 : f32
      %15 = vector.broadcast %cst : f32 to vector<8x128xf32>
      %c0_i32_8 = arith.constant 0 : i32
      %c16_i32 = arith.constant 16 : i32
      %16 = arith.muli %c0_i32_8, %c16_i32 : i32
      %17 = tpu.assume_multiple %16, 16 : i32
      %18 = arith.index_cast %17 : i32 to index
      %c0_9 = arith.constant 0 : index
      %19 = vector.load %arg3[%18, %c0_9] : memref<16x128xf32, #tpu.memory_space<vmem>>, vector<16x128xf32>
      %20 = arith.index_cast %17 : i32 to index
      %c0_10 = arith.constant 0 : index
      %21 = vector.load %arg4[%20, %c0_10] : memref<16x128xf32, #tpu.memory_space<vmem>>, vector<16x128xf32>
      %22 = math.absf %19 : vector<16x128xf32>
      %cst_11 = arith.constant 0.000000e+00 : f32
      %23 = vector.broadcast %cst_11 : f32 to vector<16x128xf32>
      %24 = arith.subf %23, %22 : vector<16x128xf32>
      %25 = math.exp %24 : vector<16x128xf32>
      %26 = math.log1p %25 : vector<16x128xf32>
      %cst_12 = arith.constant 1.000000e+00 : f32
      %27 = vector.broadcast %cst_12 : f32 to vector<16x128xf32>
      %28 = arith.addf %27, %25 : vector<16x128xf32>
      %29 = tpu.reciprocal %28 : vector<16x128xf32> -> vector<16x128xf32>
      %30 = arith.mulf %25, %29 : vector<16x128xf32>
      %cst_13 = arith.constant 0.000000e+00 : f32
      %31 = vector.broadcast %cst_13 : f32 to vector<16x128xf32>
      %32 = arith.cmpf oge, %19, %31 : vector<16x128xf32>
      %33 = arith.select %32, %29, %30 : vector<16x128xi1>, vector<16x128xf32>
      %34 = arith.select %32, %30, %29 : vector<16x128xi1>, vector<16x128xf32>
      %cst_14 = arith.constant 0.000000e+00 : f32
      %35 = vector.broadcast %cst_14 : f32 to vector<16x128xf32>
      %36 = arith.subf %35, %19 : vector<16x128xf32>
      %cst_15 = arith.constant 0.000000e+00 : f32
      %37 = vector.broadcast %cst_15 : f32 to vector<16x128xf32>
      %38 = arith.maximumf %36, %37 : vector<16x128xf32>
      %39 = arith.addf %38, %26 : vector<16x128xf32>
      %cst_16 = arith.constant 0.000000e+00 : f32
      %40 = vector.broadcast %cst_16 : f32 to vector<16x128xf32>
      %41 = arith.subf %40, %39 : vector<16x128xf32>
      %cst_17 = arith.constant 0.000000e+00 : f32
      %42 = vector.broadcast %cst_17 : f32 to vector<16x128xf32>
      %43 = arith.maximumf %19, %42 : vector<16x128xf32>
      %44 = arith.addf %43, %26 : vector<16x128xf32>
      %cst_18 = arith.constant 0.000000e+00 : f32
      %45 = vector.broadcast %cst_18 : f32 to vector<16x128xf32>
      %46 = arith.subf %45, %44 : vector<16x128xf32>
      %47 = arith.mulf %34, %34 : vector<16x128xf32>
      %48 = arith.mulf %33, %33 : vector<16x128xf32>
      %cst_19 = arith.constant -2.500000e-01 : f32
      %49 = vector.broadcast %cst_19 : f32 to vector<16x128xf32>
      %50 = arith.mulf %49, %47 : vector<16x128xf32>
      %51 = arith.mulf %50, %21 : vector<16x128xf32>
      %52 = arith.mulf %51, %41 : vector<16x128xf32>
      %cst_20 = arith.constant 7.500000e-01 : f32
      %53 = vector.broadcast %cst_20 : f32 to vector<16x128xf32>
      %54 = arith.mulf %53, %48 : vector<16x128xf32>
      %cst_21 = arith.constant 1.000000e+00 : f32
      %55 = vector.broadcast %cst_21 : f32 to vector<16x128xf32>
      %56 = arith.subf %55, %21 : vector<16x128xf32>
      %57 = arith.mulf %54, %56 : vector<16x128xf32>
      %58 = arith.mulf %57, %46 : vector<16x128xf32>
      %59 = arith.subf %52, %58 : vector<16x128xf32>
      %60 = tpu.iota {dimensions = array<i32: 0>} : vector<16x128xi32>
      %61 = tpu.iota {dimensions = array<i32: 1>} : vector<16x128xi32>
      %62 = vector.broadcast %17 : i32 to vector<16x128xi32>
      %63 = arith.addi %62, %60 : vector<16x128xi32>
      %c128_i32 = arith.constant 128 : i32
      %64 = vector.broadcast %c128_i32 : i32 to vector<16x128xi32>
      %65 = arith.muli %63, %64 : vector<16x128xi32>
      %66 = vector.broadcast %5 : i32 to vector<16x128xi32>
      %67 = arith.addi %66, %65 : vector<16x128xi32>
      %68 = arith.addi %67, %61 : vector<16x128xi32>
      %69 = vector.broadcast %6 : i32 to vector<16x128xi32>
      %70 = arith.cmpi slt, %68, %69 : vector<16x128xi32>
      %cst_22 = arith.constant 0.000000e+00 : f32
      %71 = vector.broadcast %cst_22 : f32 to vector<16x128xf32>
      %72 = arith.select %70, %59, %71 : vector<16x128xi1>, vector<16x128xf32>
      %73 = vector.shape_cast %72 : vector<16x128xf32> to vector<2x8x128xf32>
      %cst_23 = arith.constant dense<0.000000e+00> : vector<8x128xf32>
      %74 = vector.multi_reduction <add>, %73, %cst_23 [0] : vector<2x8x128xf32> to vector<8x128xf32>
      %75 = arith.addf %15, %74 : vector<8x128xf32>
      %c1_i32_24 = arith.constant 1 : i32
      %76 = vector.shape_cast %75 : vector<8x128xf32> to vector<1x8x128xf32>
      %77 = arith.addf %14, %76 : vector<1x8x128xf32>
      %c0_25 = arith.constant 0 : index
      %c0_26 = arith.constant 0 : index
      %c0_27 = arith.constant 0 : index
      %78 = vector.load %arg5[%c0_25, %c0_26, %c0_27] : memref<1x8x128xf32, #tpu.memory_space<vmem>>, vector<1x8x128xf32>
      tpu.vector_store %arg5[%c0_25, %c0_26, %c0_27], %77 {strides = array<i32>} : memref<1x8x128xf32, #tpu.memory_space<vmem>>, vector<1x8x128xf32>,
    } else {
    }
    return
  }
  func.func @transform_0(%arg0: i32, %arg1: i32, %arg2: memref<1xi32, #tpu.memory_space<smem>>) -> (i32, i32) {
    %c1_i32 = arith.constant 1 : i32
    %0 = arith.muli %arg0, %c1_i32 : i32
    %1 = arith.addi %0, %arg1 : i32
    %c0_i32 = arith.constant 0 : i32
    %2 = arith.minsi %1, %c0_i32 : i32
    %c0_i32_0 = arith.constant 0 : i32
    %c0_i32_1 = arith.constant 0 : i32
    return %2, %c0_i32_0 : i32, i32
  }
  func.func @transform_1(%arg0: i32, %arg1: i32, %arg2: memref<1xi32, #tpu.memory_space<smem>>) -> (i32, i32) {
    %c1_i32 = arith.constant 1 : i32
    %0 = arith.muli %arg0, %c1_i32 : i32
    %1 = arith.addi %0, %arg1 : i32
    %c0_i32 = arith.constant 0 : i32
    %2 = arith.minsi %1, %c0_i32 : i32
    %c0_i32_0 = arith.constant 0 : i32
    %c0_i32_1 = arith.constant 0 : i32
    return %2, %c0_i32_0 : i32, i32
  }
  func.func @transform_2(%arg0: i32, %arg1: i32, %arg2: memref<1xi32, #tpu.memory_space<smem>>) -> (i32, i32, i32) {
    %c0_i32 = arith.constant 0 : i32
    %c0_i32_0 = arith.constant 0 : i32
    %c0_i32_1 = arith.constant 0 : i32
    return %arg0, %c0_i32, %c0_i32_0 : i32, i32, i32
  }
}

</mosaic_0001>

<bundles_post_ra>
// kernel: tpu_custom_call.1
= control target key start
LH: loop header
LB: loop body
LE: loop exit
PB: predicated region body
PF: predicated region fallthrough
CT: control target
= control target key end

     0   :  { %9 = vsyncpa [#allocation5], 0  ;;  %s578_s0 = inlined_call_operand.<no memory space> [shape: s32[1], index: 0, kind: input, shape index: {}]   ;;  %s579_s1 = inlined_call_operand.hbm [shape: f32[16,128], index: 1, kind: input, shape index: {}]   ;;  %s580_s2 = inlined_call_operand.hbm [shape: f32[16,128], index: 2, kind: input, shape index: {}]   ;;  %s581_s3 = inlined_call_operand.hbm [shape: f32[1,8,128], index: 3, kind: output, shape index: {}]  }
   0x1   :  { %10 = vsyncpa [#allocation8], 0 }
   0x2   :  { %11 = vsyncpa [#allocation6], 0  ;;  %s22_s14 = sshll.u32 %s579_s1, 4  ;;  %s449_s15 = smov [#allocation4]   ;;  %s23_s14 = int_to_ptr.hbm [resolvable:$true] %s22_s14 }
   0x3   :  { %s24_s16 = sshll.u32 %s449_s15, 4  ;;  %s41_s19 = sshll.u32 %s580_s2, 4  ;;  %s25_s16 = int_to_ptr.vmem [resolvable:$true] %s24_s16  ;;  %s42_s19 = int_to_ptr.hbm [resolvable:$true] %s41_s19 }
   0x4   :  { %s450_s20 = smov 128   ;;  %s451_s21 = smov 8  }
   0x5   :  { %30 = dma.hbm_to_vmem [thread:$0]  %s23_s14, 256, %s25_s16, [#allocation5], %s450_s20, %s450_s20, %s451_s21  }
   0x6   :  { %s452_s22 = smov [#allocation7]  }
   0x7   :  { %s43_s23 = sshll.u32 %s452_s22, 4  ;;  %s44_s23 = int_to_ptr.vmem [resolvable:$true] %s43_s23 }
   0x8   :  { %49 = dma.hbm_to_vmem [thread:$0]  %s42_s19, 256, %s44_s23, [#allocation8], %s450_s20, %s450_s20, %s451_s21  }
   0x9   :  { %443 = dma.done.wait [#allocation5], 256  }
   0xa   :  { %444 = vsyncadd [#allocation5], 4294967040 }
   0xb   :  { %445 = dma.done.wait [#allocation8], 256  }
   0xc   :  { %446 = vsyncadd [#allocation8], 4294967040  ;;  %v453_v0 = vmov 0.0   ;;  %p339_p0 = scmp.lt.s32.totalorder %s578_s0, 2048 }
   0xd   :  { %70 = vst [vmem:[#allocation9] sm:$0xff] %v453_v0 }
   0xe   :  { %78 = sbr.rel (%p339_p0) target bundleno = 71 (0x47), region = 25 }
  0x13   :  { %v484_v1 = vld [vmem:[#allocation4] sm:$0xff]  ;;  %v486_v2 = vld [vmem:[#allocation4 + $0x8] sm:$0xff]  ;;  %v82_v48 = vld [vmem:[#allocation7] sm:$0xff] }
  0x14   :  { %v84_v3 = vand.u32 2147483647, %v484_v1  ;;  %v85_v4 = vand.u32 2147483647, %v486_v2  ;;  %v148_v16 = vsub.f32 0.0, %v484_v1  ;;  %v149_v17 = vsub.f32 0.0, %v486_v2 }
  0x15   :  { %v156_v47 = vmax.f32 %v484_v1, 0.0  ;;  %v157_v52 = vmax.f32 %v486_v2, 0.0  ;;  %vm142_vm10 = vcmp.ge.f32.partialorder %v484_v1, 0.0  ;;  %vm143_vm11 = vcmp.ge.f32.partialorder %v486_v2, 0.0  ;;  %v83_v58 = vld [vmem:[#allocation7 + $0x8] sm:$0xff] }
  0x16   :  { %v86_v5 = vsub.f32 0.0, %v84_v3  ;;  %v87_v6 = vsub.f32 0.0, %v85_v4  ;;  %v150_v46 = vmax.f32 %v148_v16, 0.0  ;;  %v151_v51 = vmax.f32 %v149_v17, 0.0 }
  0x17   :  { %v174_v62 = vsub.f32 1.0, %v82_v48  ;;  %v175_v1 = vsub.f32 1.0, %v83_v58 }
  0x18   :  { %v88_v7 = vmul.f32 1.442695, %v86_v5  ;;  %v90_v8 = vmul.f32 1.442695, %v87_v6 }
  0x1a   :  { %347 = vpow2.f32 %v88_v7 }
  0x1b   :  { %349 = vpow2.f32 %v90_v8 }
  0x20   :  { %v348_v9 = vpop.eup %347 }
  0x21   :  { %v350_v10 = vpop.eup %349  ;;  %v92_v11 = vadd.f32 1.0, %v348_v9  ;;  %v95_v13 = vmul.f32 -0.5, %v348_v9  ;;  %v98_v20 = vand.u32 2147483647, %v348_v9 }
  0x22   :  { %v101_v12 = vadd.f32 1.0, %v350_v10  ;;  %v104_v14 = vmul.f32 -0.5, %v350_v10  ;;  %v107_v21 = vand.u32 2147483647, %v350_v10 }
  0x23   :  { %351 = vrcp.f32 %v92_v11  ;;  %v96_v19 = vadd.f32 1.0, %v95_v13  ;;  %vm117_vm0 = vweird.f32 %v92_v11  ;;  %v123_v25 = vand.u32 2147483648, %v92_v11 }
  0x24   :  { %353 = vrcp.f32 %v101_v12  ;;  %v105_v24 = vadd.f32 1.0, %v104_v14  ;;  %v121_v29 = vand.u32 2147483647, %v92_v11  ;;  %v137_v30 = vand.u32 2147483648, %v101_v12 }
  0x25   :  { %355 = vlog2.f32 %v92_v11  ;;  %vm131_vm2 = vweird.f32 %v101_v12  ;;  %v135_v32 = vand.u32 2147483647, %v101_v12  ;;  %v97_v34 = vmul.f32 %v348_v9, %v96_v19 }
  0x26   :  { %357 = vlog2.f32 %v101_v12  ;;  %vm492_vm4 = vcmp.lt.f32.partialorder %v98_v20, 0.0004427343  ;;  %v106_v38 = vmul.f32 %v350_v10, %v105_v24  ;;  %v124_v40 = vor.u32 1.1754944e-38, %v123_v25 }
  0x27   :  { %vm108_vm6 = vcmp.lt.f32.partialorder %v107_v21, 0.0004427343  ;;  %vm122_vm7 = vcmp.eq.f32.partialorder %v121_v29, 8.507059e+37  ;;  %v138_v44 = vor.u32 1.1754944e-38, %v137_v30  ;;  %vm136_vm9 = vcmp.eq.f32.partialorder %v135_v32, 8.507059e+37 }
  0x29   :  { %v352_v15 = vpop.eup %351 }
  0x2a   :  { %v354_v18 = vpop.eup %353  ;;  %v113_v22 = vmul.f32 %v352_v15, %v92_v11  ;;  %vm118_vm1 = vweird.f32 %v352_v15 }
  0x2b   :  { %v356_v23 = vpop.eup %355  ;;  %v127_v26 = vmul.f32 %v354_v18, %v101_v12  ;;  %vm132_vm3 = vweird.f32 %v354_v18  ;;  %vm497_vm5 = vmor %vm117_vm0, %vm118_vm1 }
  0x2c   :  { %v358_v27 = vpop.eup %357  ;;  %v114_v28 = vsub.f32 1.0, %v113_v22  ;;  %v94_v33 = vmul.f32 0.6931472, %v356_v23  ;;  %vm502_vm8 = vmor %vm131_vm2, %vm132_vm3 }
  0x2d   :  { %v128_v31 = vsub.f32 1.0, %v127_v26  ;;  %v103_v37 = vmul.f32 0.6931472, %v358_v27 }
  0x2e   :  { %v115_v36 = vmul.f32 %v352_v15, %v114_v28  ;;  %v100_v49 = vsel %vm492_vm4, %v97_v34, %v94_v33  ;;  %v79_v28 = vld [vmem:[#allocation9] sm:$0xff] }
  0x2f   :  { %v129_v41 = vmul.f32 %v354_v18, %v128_v31  ;;  %v109_v53 = vsel %vm108_vm6, %v106_v38, %v103_v37  ;;  %v152_v60 = vadd.f32 %v150_v46, %v100_v49  ;;  %v158_v61 = vadd.f32 %v156_v47, %v100_v49 }
  0x30   :  { %v116_v42 = vadd.f32 %v352_v15, %v115_v36  ;;  %v153_v3 = vadd.f32 %v151_v51, %v109_v53  ;;  %v159_v4 = vadd.f32 %v157_v52, %v109_v53 }
  0x31   :  { %v130_v45 = vadd.f32 %v354_v18, %v129_v41  ;;  %v154_v13 = vsub.f32 0.0, %v152_v60 }
  0x32   :  { %v120_v50 = vsel %vm497_vm5, %v352_v15, %v116_v42  ;;  %v155_v15 = vsub.f32 0.0, %v153_v3 }
  0x33   :  { %v125_v54 = vsel %vm122_vm7, %v124_v40, %v120_v50  ;;  %v134_v55 = vsel %vm502_vm8, %v354_v18, %v130_v45 }
  0x34   :  { %v139_v56 = vsel %vm136_vm9, %v138_v44, %v134_v55  ;;  %v140_v57 = vmul.f32 %v348_v9, %v125_v54  ;;  %v160_v9 = vsub.f32 0.0, %v158_v61 }
  0x35   :  { %v141_v59 = vmul.f32 %v350_v10, %v139_v56  ;;  %v161_v10 = vsub.f32 0.0, %v159_v4 }
  0x36   :  { %v144_v63 = vsel %vm142_vm10, %v125_v54, %v140_v57  ;;  %v146_v0 = vsel %vm142_vm10, %v140_v57, %v125_v54 }
  0x37   :  { %v145_v5 = vsel %vm143_vm11, %v139_v56, %v141_v59  ;;  %v147_v6 = vsel %vm143_vm11, %v141_v59, %v139_v56  ;;  %v162_v7 = vmul.f32 %v146_v0, %v146_v0  ;;  %v164_v8 = vmul.f32 %v144_v63, %v144_v63 }
  0x38   :  { %v163_v11 = vmul.f32 %v147_v6, %v147_v6  ;;  %v165_v12 = vmul.f32 %v145_v5, %v145_v5 }
  0x39   :  { %v166_v14 = vmul.f32 -0.25, %v162_v7  ;;  %v172_v2 = vmul.f32 0.75, %v164_v8 }
  0x3a   :  { %v167_v16 = vmul.f32 -0.25, %v163_v11  ;;  %v173_v17 = vmul.f32 0.75, %v165_v12 }
  0x3b   :  { %v168_v18 = vmul.f32 %v166_v14, %v82_v48  ;;  %v176_v19 = vmul.f32 %v174_v62, %v172_v2 }
  0x3c   :  { %v169_v20 = vmul.f32 %v167_v16, %v83_v58  ;;  %v177_v21 = vmul.f32 %v175_v1, %v173_v17 }
  0x3d   :  { %v170_v22 = vmul.f32 %v168_v18, %v154_v13  ;;  %v178_v23 = vmul.f32 %v176_v19, %v160_v9 }
  0x3e   :  { %v171_v24 = vmul.f32 %v169_v20, %v155_v15  ;;  %v179_v25 = vmul.f32 %v177_v21, %v161_v10 }
  0x3f   :  { %v180_v26 = vsub.f32 %v170_v22, %v178_v23 }
  0x40   :  { %v181_v27 = vsub.f32 %v171_v24, %v179_v25 }
  0x42   :  { %v182_v29 = vadd.f32 %v181_v27, %v180_v26 }
  0x44   :  { %v184_v30 = vadd.f32 %v182_v29, %v79_v28 }
  0x46   :  { %185 = vst [vmem:[#allocation9] sm:$0xff] %v184_v30 }
  0x47 PF:  { %p340_p1 = scmp.ge.s32.totalorder %s578_s0, 2048 }
  0x49   :  { %189 = sbr.rel (%p340_p1) target bundleno = 131 (0x83), region = 29 }
  0x4e   :  { %v519_v31 = vld [vmem:[#allocation4] sm:$0xff]  ;;  %v521_v32 = vld [vmem:[#allocation4 + $0x8] sm:$0xff]  ;;  %v293_v43 = vlaneseq  ;;  %v193_v9 = vld [vmem:[#allocation7] sm:$0xff] }
  0x4f   :  { %v195_v33 = vand.u32 2147483647, %v519_v31  ;;  %v196_v34 = vand.u32 2147483647, %v521_v32  ;;  %v259_v47 = vsub.f32 0.0, %v519_v31  ;;  %v260_v48 = vsub.f32 0.0, %v521_v32 }
  0x50   :  { %v267_v49 = vmax.f32 %v519_v31, 0.0  ;;  %v536_v50 = vshrl.u32 %v293_v43, 7  ;;  %vm253_vm13 = vcmp.ge.f32.partialorder %v519_v31, 0.0  ;;  %vm254_vm15 = vcmp.ge.f32.partialorder %v521_v32, 0.0  ;;  %v194_v29 = vld [vmem:[#allocation7 + $0x8] sm:$0xff] }
  0x51   :  { %v197_v35 = vsub.f32 0.0, %v195_v33  ;;  %v198_v36 = vsub.f32 0.0, %v196_v34  ;;  %v261_v10 = vmax.f32 %v259_v47, 0.0  ;;  %v262_v19 = vmax.f32 %v260_v48, 0.0 }
  0x52   :  { %v295_v16 = vadd.s32 8, %v536_v50  ;;  %v268_v20 = vmax.f32 %v521_v32, 0.0  ;;  %v285_v24 = vsub.f32 1.0, %v193_v9  ;;  %v297_v27 = vand.u32 127, %v293_v43 }
  0x53   :  { %v199_v37 = vmul.f32 1.442695, %v197_v35  ;;  %v201_v38 = vmul.f32 1.442695, %v198_v36  ;;  %v301_v28 = vmul.u32 128, %v536_v50  ;;  %v308_v32 = vstv %s578_s0 }
  0x54   :  { %v302_v35 = vmul.u32 128, %v295_v16 }
  0x55   :  { %359 = vpow2.f32 %v199_v37  ;;  %v306_v47 = vadd.s32 %v301_v28, %v297_v27 }
  0x56   :  { %361 = vpow2.f32 %v201_v38 }
  0x57   :  { %vm309_vm8 = vcmp.lt.s32.totalorder %v306_v47, %v308_v32 }
  0x5b   :  { %v525_v39 = vpop.eup %359 }
  0x5c   :  { %v527_v40 = vpop.eup %361  ;;  %v203_v41 = vadd.f32 1.0, %v525_v39  ;;  %v206_v44 = vmul.f32 -0.5, %v525_v39  ;;  %v209_v53 = vand.u32 2147483647, %v525_v39 }
  0x5d   :  { %v212_v42 = vadd.f32 1.0, %v527_v40  ;;  %v215_v45 = vmul.f32 -0.5, %v527_v40  ;;  %v218_v54 = vand.u32 2147483647, %v527_v40 }
  0x5e   :  { %363 = vrcp.f32 %v203_v41  ;;  %v207_v52 = vadd.f32 1.0, %v206_v44  ;;  %vm228_vm12 = vweird.f32 %v203_v41  ;;  %v234_v58 = vand.u32 2147483648, %v203_v41 }
  0x5f   :  { %365 = vrcp.f32 %v212_v42  ;;  %v216_v57 = vadd.f32 1.0, %v215_v45  ;;  %v232_v62 = vand.u32 2147483647, %v203_v41  ;;  %v248_v63 = vand.u32 2147483648, %v212_v42 }
  0x60   :  { %367 = vlog2.f32 %v203_v41  ;;  %vm242_vm0 = vweird.f32 %v212_v42  ;;  %v246_v3 = vand.u32 2147483647, %v212_v42  ;;  %v208_v5 = vmul.f32 %v525_v39, %v207_v52 }
  0x61   :  { %369 = vlog2.f32 %v212_v42  ;;  %vm543_vm2 = vcmp.lt.f32.partialorder %v209_v53, 0.0004427343  ;;  %v217_v11 = vmul.f32 %v527_v40, %v216_v57  ;;  %v235_v1 = vor.u32 1.1754944e-38, %v234_v58 }
  0x62   :  { %vm219_vm4 = vcmp.lt.f32.partialorder %v218_v54, 0.0004427343  ;;  %vm233_vm5 = vcmp.eq.f32.partialorder %v232_v62, 8.507059e+37  ;;  %v249_v2 = vor.u32 1.1754944e-38, %v248_v63  ;;  %vm247_vm7 = vcmp.eq.f32.partialorder %v246_v3, 8.507059e+37 }
  0x63   :  { %v307_v57 = vadd.s32 %v302_v35, %v297_v27 }
  0x64   :  { %v364_v46 = vpop.eup %363 }
  0x65   :  { %v366_v51 = vpop.eup %365  ;;  %v224_v55 = vmul.f32 %v364_v46, %v203_v41  ;;  %vm229_vm14 = vweird.f32 %v364_v46  ;;  %vm310_vm9 = vcmp.lt.s32.totalorder %v307_v57, %v308_v32 }
  0x66   :  { %v368_v56 = vpop.eup %367  ;;  %v238_v59 = vmul.f32 %v366_v51, %v212_v42  ;;  %vm243_vm1 = vweird.f32 %v366_v51  ;;  %vm549_vm3 = vmor %vm228_vm12, %vm229_vm14 }
  0x67   :  { %v370_v60 = vpop.eup %369  ;;  %v225_v61 = vsub.f32 1.0, %v224_v55  ;;  %v205_v4 = vmul.f32 0.6931472, %v368_v56  ;;  %vm244_vm6 = vmor %vm242_vm0, %vm243_vm1 }
  0x68   :  { %v239_v0 = vsub.f32 1.0, %v238_v59  ;;  %v214_v8 = vmul.f32 0.6931472, %v370_v60 }
  0x69   :  { %v226_v7 = vmul.f32 %v364_v46, %v225_v61  ;;  %v211_v17 = vsel %vm543_vm2, %v208_v5, %v205_v4  ;;  %v190_v5 = vld [vmem:[#allocation9] sm:$0xff] }
  0x6a   :  { %v240_v13 = vmul.f32 %v366_v51, %v239_v0  ;;  %v220_v21 = vsel %vm219_vm4, %v217_v11, %v214_v8  ;;  %v263_v33 = vadd.f32 %v261_v10, %v211_v17  ;;  %v269_v34 = vadd.f32 %v267_v49, %v211_v17 }
  0x6b   :  { %v227_v14 = vadd.f32 %v364_v46, %v226_v7  ;;  %v264_v38 = vadd.f32 %v262_v19, %v220_v21  ;;  %v270_v41 = vadd.f32 %v268_v20, %v220_v21 }
  0x6c   :  { %v241_v15 = vadd.f32 %v366_v51, %v240_v13  ;;  %v265_v48 = vsub.f32 0.0, %v263_v33  ;;  %v271_v49 = vsub.f32 0.0, %v269_v34 }
  0x6d   :  { %v231_v18 = vsel %vm549_vm3, %v364_v46, %v227_v14  ;;  %v286_v46 = vsub.f32 1.0, %v194_v29  ;;  %v266_v31 = vsub.f32 0.0, %v264_v38  ;;  %v272_v52 = vsub.f32 0.0, %v270_v41 }
  0x6e   :  { %v236_v22 = vsel %vm233_vm5, %v235_v1, %v231_v18  ;;  %v245_v23 = vsel %vm244_vm6, %v366_v51, %v241_v15 }
  0x6f   :  { %v250_v25 = vsel %vm247_vm7, %v249_v2, %v245_v23  ;;  %v251_v26 = vmul.f32 %v525_v39, %v236_v22 }
  0x70   :  { %v252_v30 = vmul.f32 %v527_v40, %v250_v25 }
  0x71   :  { %v255_v36 = vsel %vm253_vm13, %v236_v22, %v251_v26  ;;  %v257_v37 = vsel %vm253_vm13, %v251_v26, %v236_v22 }
  0x72   :  { %v256_v39 = vsel %vm254_vm15, %v250_v25, %v252_v30  ;;  %v258_v42 = vsel %vm254_vm15, %v252_v30, %v250_v25  ;;  %v273_v43 = vmul.f32 %v257_v37, %v257_v37  ;;  %v275_v44 = vmul.f32 %v255_v36, %v255_v36 }
  0x73   :  { %v274_v40 = vmul.f32 %v258_v42, %v258_v42  ;;  %v276_v45 = vmul.f32 %v256_v39, %v256_v39 }
  0x74   :  { %v277_v50 = vmul.f32 -0.25, %v273_v43  ;;  %v283_v51 = vmul.f32 0.75, %v275_v44 }
  0x75   :  { %v278_v53 = vmul.f32 -0.25, %v274_v40  ;;  %v284_v54 = vmul.f32 0.75, %v276_v45 }
  0x76   :  { %v279_v55 = vmul.f32 %v277_v50, %v193_v9  ;;  %v287_v56 = vmul.f32 %v285_v24, %v283_v51 }
  0x77   :  { %v280_v58 = vmul.f32 %v278_v53, %v194_v29  ;;  %v288_v59 = vmul.f32 %v286_v46, %v284_v54 }
  0x78   :  { %v281_v60 = vmul.f32 %v279_v55, %v265_v48  ;;  %v289_v61 = vmul.f32 %v287_v56, %v271_v49 }
  0x79   :  { %v282_v62 = vmul.f32 %v280_v58, %v266_v31  ;;  %v290_v63 = vmul.f32 %v288_v59, %v272_v52 }
  0x7a   :  { %v291_v0 = vsub.f32 %v281_v60, %v289_v61 }
  0x7b   :  { %v292_v3 = vsub.f32 %v282_v62, %v290_v63 }
  0x7c   :  { %v311_v4 = vsel %vm309_vm8, %v291_v0, 0.0 }
  0x7d   :  { %v312_v6 = vsel %vm310_vm9, %v292_v3, 0.0 }
  0x7e   :  { %v313_v7 = vadd.f32 %v312_v6, %v311_v4 }
  0x80   :  { %v315_v8 = vadd.f32 %v313_v7, %v190_v5 }
  0x82   :  { %316 = vst [vmem:[#allocation9] sm:$0xff] %v315_v8 }
  0x83 PF:  { %s324_s0 = sshll.u32 %s581_s3, 4  ;;  %s454_s30 = smov [#allocation9]   ;;  %s325_s0 = int_to_ptr.hbm [resolvable:$true] %s324_s0 }
  0x84   :  { %s322_s4 = sshll.u32 %s454_s30, 4  ;;  %s323_s4 = int_to_ptr.vmem [resolvable:$true] %s322_s4 }
  0x85   :  { %327 = dma.vmem_to_hbm [thread:$0]  %s323_s4, 128, %s325_s0, [#allocation6]  }
  0x86   :  { %447 = dma.done.wait [#allocation6], 128  }
  0x87   :  { %448 = vsyncadd [#allocation6], 4294967168 }
  0x88   :  { %332 = vsyncpa [#allocation5], 1 }
  0x89   :  { %333 = vsyncpa [#allocation8], 1 }
  0x8a   :  { %334 = vsyncpa [#allocation6], 1 }

</bundles_post_ra>
